<compile_context>
chip_gen: v7x
topology: tpu7x:2x2x1
jax: 0.10.0
libtpu: 0.0.40
codegen_flags: <defaults>
</compile_context>

<pallas_src>
import functools

import jax
import jax.numpy as jnp
from jax.experimental import pallas as pl
from jax.experimental.pallas import tpu as pltpu

LANES = 128
SUBLANES = 8


def _weight_rating_loss_kernel(pred_ref, tgt_ref, out_ref, acc_ref, *,
                               alpha, beta, low_boost, high_boost,
                               row_tile, n_true, needs_mask):
    i = pl.program_id(0)

    # acc_ref is the resident (8, 128) partial-sum accumulator (VMEM scratch,
    # persists across the 1-D "arbitrary" reduction grid).
    @pl.when(i == 0)
    def _():
        acc_ref[...] = jnp.zeros_like(acc_ref)

    # Stream in native dtype, upcast to f32 for the arithmetic.
    p = pred_ref[...].astype(jnp.float32)
    t = tgt_ref[...].astype(jnp.float32)

    base_loss = jnp.abs(p - t)

    d = t - 0.5
    if beta == 2.0:          # default: abs is redundant for an even power
        extremity = d * d
    elif beta == 1.0:
        extremity = jnp.abs(d)
    else:
        extremity = jnp.abs(d) ** beta

    # low/high masks are disjoint (t < 0.3 vs t > 0.9), so nesting is safe.
    rating_factor = jnp.where(t < 0.3, low_boost,
                              jnp.where(t > 0.9, high_boost, 1.0))
    weighted = base_loss * (1.0 + alpha * extremity) * rating_factor

    if needs_mask:
        rows_blk, lanes = pred_ref.shape
        row_ids = jax.lax.broadcasted_iota(jnp.int32, (rows_blk, lanes), 0)
        lane_ids = jax.lax.broadcasted_iota(jnp.int32, (rows_blk, lanes), 1)
        # int32 flat index: fine for < 2^31 elements (typical loss sizes).
        flat_idx = (i * row_tile + row_ids) * lanes + lane_ids
        weighted = jnp.where(flat_idx < n_true, weighted, 0.0)

    # Pure VPU vreg adds: fold the (row_tile, 128) block into the (8, 128)
    # resident accumulator.
    acc_ref[...] += weighted.reshape(-1, SUBLANES, LANES).sum(axis=0)

    # Single cross-lane/sublane reduce + mean normalization, once, on the
    # last step -> (1, 1) scalar output, no host-side follow-up reduce.
    @pl.when(i == pl.num_programs(0) - 1)
    def _():
        out_ref[...] = jnp.sum(acc_ref[...], keepdims=True) * (1.0 / n_true)


def weight_rating_loss(predictions, targets, *, alpha=3.0, beta=2.0,
                       low_rating_boost=3.0, high_rating_boost=2.0,
                       row_tile=4096):
    assert predictions.shape == targets.shape
    n_true = int(predictions.size)

    p = jnp.asarray(predictions)
    t = jnp.asarray(targets)

    # Stream f32 / bf16 natively; anything else is upcast to f32 on host.
    def _prep(x):
        if x.dtype == jnp.float32 or x.dtype == jnp.bfloat16:
            return x
        return x.astype(jnp.float32)
    p = _prep(p)
    t = _prep(t)
    if p.dtype != t.dtype:
        p = p.astype(jnp.float32)
        t = t.astype(jnp.float32)

    p = p.reshape(-1)
    t = t.reshape(-1)

    # Tiny tail pad (<= 127 elems) only if the flat length is not a lane
    # multiple; the pad values are masked out in-kernel, so zeros are fine.
    lane_pad = (-n_true) % LANES
    if lane_pad:
        p = jnp.pad(p, (0, lane_pad))
        t = jnp.pad(t, (0, lane_pad))
    rows = (n_true + lane_pad) // LANES

    # Sublane granule per streamed dtype (f32 -> 8, bf16 -> 16).
    granule = 8 if p.dtype == jnp.float32 else 16
    rt = max(granule, (int(row_tile) // granule) * granule)
    rows_rounded = ((rows + granule - 1) // granule) * granule
    rt = min(rt, rows_rounded)          # clamp tile for small inputs
    num_tiles = pl.cdiv(rows, rt)

    needs_mask = bool(lane_pad) or (rows % rt != 0)

    p2 = p.reshape(rows, LANES)
    t2 = t.reshape(rows, LANES)

    kernel = functools.partial(
        _weight_rating_loss_kernel,
        alpha=float(alpha), beta=float(beta),
        low_boost=float(low_rating_boost), high_boost=float(high_rating_boost),
        row_tile=rt, n_true=n_true, needs_mask=needs_mask)

    out = pl.pallas_call(
        kernel,
        out_shape=jax.ShapeDtypeStruct((1, 1), jnp.float32),
        grid_spec=pltpu.PrefetchScalarGridSpec(
            num_scalar_prefetch=0,
            grid=(num_tiles,),
            in_specs=[
                pl.BlockSpec((rt, LANES), lambda i: (i, 0)),
                pl.BlockSpec((rt, LANES), lambda i: (i, 0)),
            ],
            out_specs=pl.BlockSpec((1, 1), lambda i: (0, 0)),
            scratch_shapes=[pltpu.VMEM((SUBLANES, LANES), jnp.float32)],
        ),
        compiler_params=pltpu.CompilerParams(
            dimension_semantics=("arbitrary",)),
    )(p2, t2)

    return out[0, 0]


def _reference(predictions, targets, alpha=3.0, beta=2.0,
               low_rating_boost=3.0, high_rating_boost=2.0):
    base = jnp.abs(predictions - targets)
    ext = jnp.abs(targets - 0.5) ** beta
    factor = jnp.where(targets < 0.3, low_rating_boost,
                       jnp.where(targets > 0.9, high_rating_boost, 1.0))
    return jnp.mean(base * (1.0 + alpha * ext) * factor)


if __name__ == "__main__":
    key = jax.random.PRNGKey(0)
    kp, kt = jax.random.split(key)

    # small shapes consistent with a rating-regression loss
    shape = (2, 4, 16, 16)
    predictions = jax.random.uniform(kp, shape, dtype=jnp.float32)
    targets = jax.random.uniform(kt, shape, dtype=jnp.float32)

    loss = weight_rating_loss(predictions, targets)
    loss = jax.block_until_ready(loss)
    ref = _reference(predictions, targets)
    assert jnp.allclose(loss, ref, rtol=1e-5, atol=1e-6), (loss, ref)

    # ragged size: exercises the lane-tail + partial-block masking path
    kp2, kt2 = jax.random.split(kt)
    shape2 = (3, 5, 7)
    pred2 = jax.random.uniform(kp2, shape2, dtype=jnp.float32)
    tgt2 = jax.random.uniform(kt2, shape2, dtype=jnp.float32)
    loss2 = jax.block_until_ready(weight_rating_loss(pred2, tgt2))
    ref2 = _reference(pred2, tgt2)
    assert jnp.allclose(loss2, ref2, rtol=1e-5, atol=1e-6), (loss2, ref2)

    print("KERNEL_OK")
</pallas_src>

<mosaic_0001>
module attributes {stable_mosaic.version = 11 : i64} {
  func.func @_weight_rating_loss_kernel(%arg0: i32, %arg1: memref<16x128xf32, #tpu.memory_space<vmem>>, %arg2: memref<16x128xf32, #tpu.memory_space<vmem>>, %arg3: memref<1x1xf32, #tpu.memory_space<vmem>>, %arg4: memref<8x128xf32, #tpu.memory_space<vmem>>) attributes {dimension_semantics = [#tpu.dimension_semantics<arbitrary>], iteration_bounds = array<i64: 1>, scalar_prefetch = 0 : i64, scratch_operands = 1 : i64, tpu.core_type = #tpu.core_type<tc>, window_params = [{transform_indices = @transform_0, window_bounds = array<i64: 16, 128>}, {transform_indices = @transform_1, window_bounds = array<i64: 16, 128>}, {pipeline_mode = #tpu.pipeline_mode<synchronous>, transform_indices = @transform_2, window_bounds = array<i64: 1, 1>}]} {
    %c0_i32 = arith.constant 0 : i32
    %0 = arith.cmpi eq, %arg0, %c0_i32 : i32
    %1 = arith.extui %0 : i1 to i32
    %c0_i32_0 = arith.constant 0 : i32
    %2 = arith.cmpi ne, %1, %c0_i32_0 : i32
    scf.if %2 {
      %cst_18 = arith.constant 0.000000e+00 : f32
      %33 = vector.broadcast %cst_18 : f32 to vector<8x128xf32>
      %c0_19 = arith.constant 0 : index
      %c0_20 = arith.constant 0 : index
      %34 = vector.load %arg4[%c0_19, %c0_20] : memref<8x128xf32, #tpu.memory_space<vmem>>, vector<8x128xf32>
      tpu.vector_store %arg4[%c0_19, %c0_20], %33 {strides = array<i32>} : memref<8x128xf32, #tpu.memory_space<vmem>>, vector<8x128xf32>,
    } else {
    }
    %c0 = arith.constant 0 : index
    %c0_1 = arith.constant 0 : index
    %3 = vector.load %arg1[%c0, %c0_1] : memref<16x128xf32, #tpu.memory_space<vmem>>, vector<16x128xf32>
    %c0_2 = arith.constant 0 : index
    %c0_3 = arith.constant 0 : index
    %4 = vector.load %arg2[%c0_2, %c0_3] : memref<16x128xf32, #tpu.memory_space<vmem>>, vector<16x128xf32>
    %5 = arith.subf %3, %4 : vector<16x128xf32>
    %6 = math.absf %5 : vector<16x128xf32>
    %cst = arith.constant 5.000000e-01 : f32
    %7 = vector.broadcast %cst : f32 to vector<16x128xf32>
    %8 = arith.subf %4, %7 : vector<16x128xf32>
    %9 = arith.mulf %8, %8 : vector<16x128xf32>
    %cst_4 = arith.constant 3.000000e-01 : f32
    %10 = vector.broadcast %cst_4 : f32 to vector<16x128xf32>
    %11 = arith.cmpf olt, %4, %10 : vector<16x128xf32>
    %cst_5 = arith.constant 0.899999976 : f32
    %12 = vector.broadcast %cst_5 : f32 to vector<16x128xf32>
    %13 = arith.cmpf ogt, %4, %12 : vector<16x128xf32>
    %cst_6 = arith.constant 2.000000e+00 : f32
    %cst_7 = arith.constant 1.000000e+00 : f32
    %14 = vector.broadcast %cst_6 : f32 to vector<16x128xf32>
    %15 = vector.broadcast %cst_7 : f32 to vector<16x128xf32>
    %16 = arith.select %13, %14, %15 : vector<16x128xi1>, vector<16x128xf32>
    %cst_8 = arith.constant 3.000000e+00 : f32
    %17 = vector.broadcast %cst_8 : f32 to vector<16x128xf32>
    %18 = arith.select %11, %17, %16 : vector<16x128xi1>, vector<16x128xf32>
    %cst_9 = arith.constant 3.000000e+00 : f32
    %19 = vector.broadcast %cst_9 : f32 to vector<16x128xf32>
    %20 = arith.mulf %19, %9 : vector<16x128xf32>
    %cst_10 = arith.constant 1.000000e+00 : f32
    %21 = vector.broadcast %cst_10 : f32 to vector<16x128xf32>
    %22 = arith.addf %21, %20 : vector<16x128xf32>
    %23 = arith.mulf %6, %22 : vector<16x128xf32>
    %24 = arith.mulf %23, %18 : vector<16x128xf32>
    %c0_11 = arith.constant 0 : index
    %c0_12 = arith.constant 0 : index
    %25 = vector.load %arg4[%c0_11, %c0_12] : memref<8x128xf32, #tpu.memory_space<vmem>>, vector<8x128xf32>
    %26 = vector.shape_cast %24 : vector<16x128xf32> to vector<2x8x128xf32>
    %cst_13 = arith.constant dense<0.000000e+00> : vector<8x128xf32>
    %27 = vector.multi_reduction <add>, %26, %cst_13 [0] : vector<2x8x128xf32> to vector<8x128xf32>
    %28 = arith.addf %25, %27 : vector<8x128xf32>
    %c0_14 = arith.constant 0 : index
    %c0_15 = arith.constant 0 : index
    %29 = vector.load %arg4[%c0_14, %c0_15] : memref<8x128xf32, #tpu.memory_space<vmem>>, vector<8x128xf32>
    tpu.vector_store %arg4[%c0_14, %c0_15], %28 {strides = array<i32>} : memref<8x128xf32, #tpu.memory_space<vmem>>, vector<8x128xf32>,
    %c0_i32_16 = arith.constant 0 : i32
    %30 = arith.cmpi eq, %arg0, %c0_i32_16 : i32
    %31 = arith.extui %30 : i1 to i32
    %c0_i32_17 = arith.constant 0 : i32
    %32 = arith.cmpi ne, %31, %c0_i32_17 : i32
    scf.if %32 {
      %c0_18 = arith.constant 0 : index
      %c0_19 = arith.constant 0 : index
      %33 = vector.load %arg4[%c0_18, %c0_19] : memref<8x128xf32, #tpu.memory_space<vmem>>, vector<8x128xf32>
      %34 = vector.shape_cast %33 : vector<8x128xf32> to vector<1x8x128xf32>
      %cst_20 = arith.constant dense<0.000000e+00> : vector<1xf32>
      %35 = vector.multi_reduction <add>, %34, %cst_20 [1, 2] : vector<1x8x128xf32> to vector<1xf32>
      %36 = vector.shape_cast %35 : vector<1xf32> to vector<1x1x1xf32>
      %37 = vector.extract %36[0, 0, 0] : f32 from vector<1x1x1xf32>
      %38 = vector.broadcast %37 : f32 to vector<1x1xf32>
      %cst_21 = arith.constant 4.8828125E-4 : f32
      %39 = vector.broadcast %cst_21 : f32 to vector<1x1xf32>
      %40 = arith.mulf %38, %39 : vector<1x1xf32>
      %c0_22 = arith.constant 0 : index
      %c0_23 = arith.constant 0 : index
      %41 = vector.load %arg3[%c0_22, %c0_23] : memref<1x1xf32, #tpu.memory_space<vmem>>, vector<1x1xf32>
      tpu.vector_store %arg3[%c0_22, %c0_23], %40 {strides = array<i32>} : memref<1x1xf32, #tpu.memory_space<vmem>>, vector<1x1xf32>,
    } else {
    }
    return
  }
  func.func @transform_0(%arg0: i32) -> (i32, i32) {
    %c0_i32 = arith.constant 0 : i32
    %c0_i32_0 = arith.constant 0 : i32
    return %arg0, %c0_i32 : i32, i32
  }
  func.func @transform_1(%arg0: i32) -> (i32, i32) {
    %c0_i32 = arith.constant 0 : i32
    %c0_i32_0 = arith.constant 0 : i32
    return %arg0, %c0_i32 : i32, i32
  }
  func.func @transform_2(%arg0: i32) -> (i32, i32) {
    %c0_i32 = arith.constant 0 : i32
    %c0_i32_0 = arith.constant 0 : i32
    %c0_i32_1 = arith.constant 0 : i32
    return %c0_i32, %c0_i32_0 : i32, i32
  }
}

</mosaic_0001>

<bundles_post_ra>
// kernel: tpu_custom_call.1
= control target key start
LH: loop header
LB: loop body
LE: loop exit
PB: predicated region body
PF: predicated region fallthrough
CT: control target
= control target key end

     0   :  { %7 = vsyncpa [#allocation4], 0  ;;  %s249_s0 = inlined_call_operand.hbm [shape: f32[16,128], index: 0, kind: input, shape index: {}]   ;;  %s250_s1 = inlined_call_operand.hbm [shape: f32[16,128], index: 1, kind: input, shape index: {}]   ;;  %s251_s2 = inlined_call_operand.hbm [shape: f32[1,1], index: 2, kind: output, shape index: {}]  }
   0x1   :  { %8 = vsyncpa [#allocation7], 0 }
   0x2   :  { %9 = vsyncpa [#allocation5], 0  ;;  %s192_s9 = smov [#allocation3]   ;;  %s120_s13 = scalar_lea.hbm %s249_s0, 256 }
   0x3   :  { %s15_s10 = sshll.u32 %s192_s9, 4  ;;  %p121_p0 = scmp.ne.s32.totalorder %s249_s0, %s120_s13  ;;  %s16_s10 = int_to_ptr.vmem [resolvable:$true] %s15_s10 }
   0x4   :  { %p124_p1 = scmp.lt.u32.totalorder %s120_s13, %s249_s0 }
   0x6   :  { %p126_p2 = pnand %p124_p1, %p121_p0 }
   0x8   :  { %129 = shalt.err (!%p126_p2)
}
   0x9   :  { %s130_s18 = scalar_lea.vmem %s16_s10, 256  ;;  %p135_p4 = scmp.lt.s32.totalorder %s16_s10, %s16_s10 }
   0xa   :  { %p131_p3 = scmp.ne.s32.totalorder %s16_s10, %s130_s18  ;;  %p136_p5 = scmp.lt.s32.totalorder %s130_s18, %s130_s18 }
   0xc   :  { %p137_p6 = por %p136_p5, %p135_p4 }
   0xe   :  { %p138_p7 = pnand %p137_p6, %p131_p3 }
  0x10   :  { %141 = shalt.err (!%p138_p7)
}
  0x11   :  { %s193_s19 = smov 128   ;;  %s194_s20 = smov 8  }
  0x12   :  { %21 = dma.hbm_to_vmem [thread:$0]  %s249_s0, 256, %s16_s10, [#allocation4], %s193_s19, %s193_s19, %s194_s20  }
  0x13   :  { %s195_s23 = smov [#allocation6]   ;;  %s142_s27 = scalar_lea.hbm %s250_s1, 256 }
  0x14   :  { %s27_s24 = sshll.u32 %s195_s23, 4  ;;  %p143_p8 = scmp.ne.s32.totalorder %s250_s1, %s142_s27  ;;  %s28_s24 = int_to_ptr.vmem [resolvable:$true] %s27_s24 }
  0x15   :  { %p146_p9 = scmp.lt.u32.totalorder %s142_s27, %s250_s1 }
  0x17   :  { %p148_p10 = pnand %p146_p9, %p143_p8 }
  0x19   :  { %151 = shalt.err (!%p148_p10)
}
  0x1a   :  { %s152_s4 = scalar_lea.vmem %s28_s24, 256  ;;  %p157_p12 = scmp.lt.s32.totalorder %s28_s24, %s28_s24 }
  0x1b   :  { %p153_p11 = scmp.ne.s32.totalorder %s28_s24, %s152_s4  ;;  %p158_p13 = scmp.lt.s32.totalorder %s152_s4, %s152_s4 }
  0x1d   :  { %p159_p0 = por %p158_p13, %p157_p12 }
  0x1f   :  { %p160_p1 = pnand %p159_p0, %p153_p11 }
  0x21   :  { %163 = shalt.err (!%p160_p1)
}
  0x22   :  { %33 = dma.hbm_to_vmem [thread:$0]  %s250_s1, 256, %s28_s24, [#allocation7], %s193_s19, %s193_s19, %s194_s20  }
  0x23   :  { %186 = dma.done.wait [#allocation4], 256  }
  0x24   :  { %187 = vsyncadd [#allocation4], 4294967040 }
  0x25   :  { %188 = dma.done.wait [#allocation7], 256  }
  0x26   :  { %189 = vsyncadd [#allocation7], 4294967040  ;;  %v45_v0 = vld [vmem:[#allocation3] sm:$0xff]  ;;  %v46_v1 = vld [vmem:[#allocation3 + $0x8] sm:$0xff]  ;;  %v196_v11 = vmov 1.0   ;;  %s197_s1 = smov [#allocation8]  }
  0x27   :  { %v47_v2 = vld [vmem:[#allocation6] sm:$0xff]  ;;  %v48_v3 = vld [vmem:[#allocation6 + $0x8] sm:$0xff]  ;;  %s100_s6 = sshll.u32 %s197_s1, 4  ;;  %vm92_vm4 = vcmask 0   ;;  %s101_s6 = int_to_ptr.vmem [resolvable:$true] %s100_s6 }
  0x28   :  { %v49_v4 = vsub.f32 %v45_v0, %v47_v2  ;;  %v110_v5 = vadd.f32 -0.5, %v47_v2  ;;  %v50_v6 = vsub.f32 %v46_v1, %v48_v3  ;;  %v111_v7 = vadd.f32 -0.5, %v48_v3  ;;  %s164_s8 = scalar_lea.vmem %s101_s6, 16  ;;  %s168_s9 = scalar_lea.vmem %s101_s6, 32 }
  0x29   :  { %vm59_vm0 = vcmp.gt.f32.partialorder %v47_v2, 0.9  ;;  %vm60_vm1 = vcmp.gt.f32.partialorder %v48_v3, 0.9  ;;  %vm57_vm2 = vcmp.lt.f32.partialorder %v47_v2, 0.3  ;;  %p165_p2 = scmp.ne.s32.totalorder %s101_s6, %s164_s8  ;;  %p169_p3 = scmp.lt.s32.totalorder %s101_s6, %s101_s6 }
  0x2a   :  { %v55_v8 = vmul.f32 %v110_v5, %v110_v5  ;;  %v56_v9 = vmul.f32 %v111_v7, %v111_v7  ;;  %v51_v10 = vand.u32 2147483647, %v49_v4  ;;  %v61_v12 = vsel %vm59_vm0, 2.0, %v196_v11  ;;  %p170_p4 = scmp.lt.s32.totalorder %s168_s9, %s164_s8 }
  0x2b   :  { %v52_v14 = vand.u32 2147483647, %v50_v6  ;;  %vm58_vm3 = vcmp.lt.f32.partialorder %v48_v3, 0.3  ;;  %v62_v15 = vsel %vm60_vm1, 2.0, %v196_v11  ;;  %v63_v18 = vsel %vm57_vm2, 3.0, %v61_v12 }
  0x2c   :  { %v65_v13 = vmul.f32 3.0, %v55_v8  ;;  %v66_v16 = vmul.f32 3.0, %v56_v9  ;;  %v64_v20 = vsel %vm58_vm3, 3.0, %v62_v15  ;;  %p171_p5 = por %p170_p4, %p169_p3 }
  0x2e   :  { %v67_v17 = vadd.f32 1.0, %v65_v13  ;;  %v68_v19 = vadd.f32 1.0, %v66_v16  ;;  %p172_p6 = pnand %p171_p5, %p165_p2 }
  0x30   :  { %v69_v21 = vmul.f32 %v67_v17, %v51_v10  ;;  %v70_v22 = vmul.f32 %v68_v19, %v52_v14 }
  0x32   :  { %v71_v23 = vmul.f32 %v69_v21, %v63_v18  ;;  %v72_v24 = vmul.f32 %v70_v22, %v64_v20 }
  0x34   :  { %v74_v25 = vadd.f32 %v72_v24, %v71_v23 }
  0x36   :  { %81 = vadd.xlane.f32.xlu0 %v74_v25 }
  0xc3   :  { %v82_v26 = vpop.xlane.xlu0 %81 }
  0xc4   :  { %v83_v27 = vrot.slane %v82_v26, 4 }
  0xc6   :  { %v84_v28 = vadd.f32 %v83_v27, %v82_v26 }
  0xc8   :  { %v85_v29 = vrot.slane %v84_v28, 2 }
  0xca   :  { %v86_v30 = vadd.f32 %v85_v29, %v84_v28 }
  0xcc   :  { %v87_v31 = vrot.slane %v86_v30, 1 }
  0xce   :  { %v88_v32 = vadd.f32 %v87_v31, %v86_v30 }
  0xd0   :  { %112 = vpush %v88_v32 }
 0x101   :  { %s113_s7 = spop %112 }
 0x102   :  { %v90_v33 = vstv %s113_s7 }
 0x103   :  { %v91_v34 = vmul.f32 0.00048828125, %v90_v33 }
 0x105   :  { %93 = vst.msk [vmem:[#allocation8] sm:$0x1] %vm92_vm4, %v91_v34 }
 0x106   :  { %175 = shalt.err (!%p172_p6)
}
 0x107   :  { %s176_s12 = scalar_lea.hbm %s251_s2, 16 }
 0x108   :  { %p177_p7 = scmp.ne.s32.totalorder %s251_s2, %s176_s12  ;;  %p180_p8 = scmp.lt.u32.totalorder %s176_s12, %s251_s2 }
 0x10a   :  { %p182_p9 = pnand %p180_p8, %p177_p7 }
 0x10c   :  { %185 = shalt.err (!%p182_p9)
}
 0x10d   :  { %103 = dma.vmem_to_hbm [thread:$0]  %s101_s6, 16, %s251_s2, [#allocation5]  }
 0x10e   :  { %190 = dma.done.wait [#allocation5], 16  }
 0x10f   :  { %191 = vsyncadd [#allocation5], 4294967280 }
 0x110   :  { %107 = vsyncpa [#allocation4], 1 }
 0x111   :  { %108 = vsyncpa [#allocation7], 1 }
 0x112   :  { %109 = vsyncpa [#allocation5], 1 }

</bundles_post_ra>
